<compile_context>
chip_gen: v7x
topology: tpu7x:2x2x1
jax: 0.10.0
libtpu: 0.0.40
codegen_flags: <defaults>
</compile_context>

<pallas_src>
import functools

import jax
import jax.numpy as jnp
from jax.experimental import pallas as pl
from jax.experimental.pallas import tpu as pltpu


def _round_up(x, m):
    return ((x + m - 1) // m) * m


def _mlp_kernel(num_hidden_layers, output_dim,
                x_ref, w_in_ref, b_in_ref, w_h_ref, b_h_ref, w_out_ref, b_out_ref,
                o_ref):
    """One batch tile of the fused MLP.

    x_ref:     [T, Din]     f32   (unpadded feature dim; cast to bf16 here, on-chip)
    w_in_ref:  [Din, Hp]    bf16     b_in_ref:  [1, Hp]    f32
    w_h_ref:   [L, Hp, Hp]  bf16     b_h_ref:   [L, 1, Hp] f32
    w_out_ref: [Hp, Op]     bf16     b_out_ref: [1, Op]    f32
    o_ref:     [T, output_dim] f32  (unpadded -> no write amplification)
    """
    cdt = w_in_ref.dtype

    # Hoisted reads (once per tile, reused across the unrolled layer loop).
    x = x_ref[...].astype(cdt)            # f32 -> bf16 cast on the VPU, not in HBM
    b_in = b_in_ref[...]
    b_h = b_h_ref[...]
    b_out = b_out_ref[...]

    # Input projection (no activation, matches the PyTorch module).
    # bf16 MXU inputs, f32 accumulation; inter-layer activations stored as bf16.
    acc = jnp.dot(x, w_in_ref[...], preferred_element_type=jnp.float32) + b_in
    h = acc.astype(cdt)

    # Hidden layers: Linear + ReLU.  Bias add / ReLU in f32, result narrowed to bf16.
    for li in range(num_hidden_layers):
        acc = jnp.dot(h, w_h_ref[li], preferred_element_type=jnp.float32) + b_h[li]
        h = jnp.maximum(acc, 0.0).astype(cdt)

    # Output projection (no activation).  Only the real output_dim lanes are stored.
    out = jnp.dot(h, w_out_ref[...], preferred_element_type=jnp.float32) + b_out
    o_ref[...] = out[:, :output_dim].astype(o_ref.dtype)


def prepare_params(params, compute_dtype=jnp.bfloat16):
    """Pad + cast the weights ONCE (not on every forward call).

    Weights are stored transposed vs PyTorch ([in_features, out_features]); hidden layers
    are stacked ([L,H,H] / [L,1,H]).  Hidden/output feature dims are zero-padded to
    multiples of 128 (exact: padded weight rows/cols are 0, so padded lanes stay 0 through
    every Linear+ReLU).  The input feature dim of x / w_in is left unpadded: a full-dim
    block is legal and the MXU pads the contraction internally.
    """
    input_dim, hidden_dim = params["w_in"].shape
    output_dim = params["w_out"].shape[1]
    num_layers = int(params["w_hidden"].shape[0])
    h_p = _round_up(hidden_dim, 128)
    o_p = _round_up(output_dim, 128)
    hpad = h_p - hidden_dim
    opad = o_p - output_dim

    w_in = jnp.pad(params["w_in"], ((0, 0), (0, hpad))).astype(compute_dtype)
    b_in = jnp.pad(params["b_in"], ((0, 0), (0, hpad))).astype(jnp.float32)
    w_h = jnp.pad(params["w_hidden"], ((0, 0), (0, hpad), (0, hpad))).astype(compute_dtype)
    b_h = jnp.pad(params["b_hidden"], ((0, 0), (0, 0), (0, hpad))).astype(jnp.float32)
    w_out = jnp.pad(params["w_out"], ((0, hpad), (0, opad))).astype(compute_dtype)
    b_out = jnp.pad(params["b_out"], ((0, 0), (0, opad))).astype(jnp.float32)

    return {
        "w_in": w_in, "b_in": b_in, "w_hidden": w_h, "b_hidden": b_h,
        "w_out": w_out, "b_out": b_out,
        "input_dim": input_dim, "hidden_dim": hidden_dim,
        "output_dim": output_dim, "num_layers": num_layers,
    }


def embedding_classification_forward(x, prep, *, max_batch_tile=2048,
                                     split_batch_across_cores=True):
    """Fused MLP forward as a single Pallas kernel, tiled over the batch only."""
    B, input_dim = x.shape
    assert input_dim == prep["input_dim"]
    hidden_dim = prep["hidden_dim"]
    output_dim = prep["output_dim"]
    num_layers = prep["num_layers"]
    assert num_layers >= 1

    # Batch tiling.  For B > 64 split the batch into >= 2 tiles so the "parallel" grid axis
    # has >= 2 steps (keeps both v7x TensorCores busy, enables DMA/compute overlap).  Tiles
    # up to 2048 rows amortize the ~0.35 us per-grid-step overhead; the footprint stays a
    # few MiB, well under the explicit 32 MiB VMEM limit below on v5e/v6e/v7x.
    if split_batch_across_cores and B > 64:
        batch_tile = min(_round_up((B + 1) // 2, 8), max_batch_tile)
    else:
        batch_tile = min(_round_up(B, 8), max_batch_tile)
    b_p = _round_up(B, batch_tile)
    grid = (b_p // batch_tile,)

    # Only the batch axis is ever padded, and only when B is not tile-aligned; x stays
    # unpadded f32 along features and is cast to bf16 inside the kernel (no extra HBM
    # pad/cast pass over the activations).
    if b_p != B:
        x = jnp.pad(x, ((0, b_p - B), (0, 0)))

    w_in, b_in = prep["w_in"], prep["b_in"]
    w_h, b_h = prep["w_hidden"], prep["b_hidden"]
    w_out, b_out = prep["w_out"], prep["b_out"]

    # Resident (constant index_map) weights.  The pipeliner double-buffers them by default;
    # when the stacked weights get big (large H / L) fall back to single-buffering so they
    # cannot blow v7x's 64 MiB physical / v5e's 16 MiB scoped VMEM.
    resident_bytes = sum(int(a.size) * a.dtype.itemsize
                         for a in (w_in, b_in, w_h, b_h, w_out, b_out))
    single_buffer_weights = (2 * resident_bytes) > (8 * 1024 * 1024)
    # TODO(synk): if 2*L*Hp^2 bytes exceeds ~VMEM/4, stream w_hidden over an extra
    # "arbitrary" layer grid axis instead of keeping it resident.

    def resident(arr):
        nd = arr.ndim
        if single_buffer_weights:
            return pl.BlockSpec(arr.shape, lambda i, _nd=nd: (0,) * _nd,
                                pipeline_mode=pl.Buffered(1))
        return pl.BlockSpec(arr.shape, lambda i, _nd=nd: (0,) * _nd)

    kernel = functools.partial(_mlp_kernel, num_layers, output_dim)

    flops = 2 * B * (input_dim * hidden_dim
                     + num_layers * hidden_dim * hidden_dim
                     + hidden_dim * output_dim)
    bytes_accessed = (int(x.size) * x.dtype.itemsize
                      + resident_bytes
                      + B * output_dim * 4)

    out_p = pl.pallas_call(
        kernel,
        out_shape=jax.ShapeDtypeStruct((b_p, output_dim), jnp.float32),
        grid=grid,
        in_specs=[
            pl.BlockSpec((batch_tile, input_dim), lambda i: (i, 0)),
            resident(w_in), resident(b_in),
            resident(w_h), resident(b_h),
            resident(w_out), resident(b_out),
        ],
        out_specs=pl.BlockSpec((batch_tile, output_dim), lambda i: (i, 0)),
        compiler_params=pltpu.CompilerParams(
            dimension_semantics=("parallel",),
            vmem_limit_bytes=32 * 1024 * 1024),
        cost_estimate=pl.CostEstimate(flops=flops, transcendentals=0,
                                      bytes_accessed=bytes_accessed),
    )(x, w_in, b_in, w_h, b_h, w_out, b_out)

    return out_p if b_p == B else out_p[:B]


def init_params(key, input_dim, output_dim, hidden_dim=256, num_layers=2):
    """Deterministic init mimicking PyTorch Linear default (uniform +-1/sqrt(fan_in)).

    Weights are stored as [in_features, out_features]; hidden layers are stacked."""
    def linear_init(k, fan_in, fan_out):
        kw, kb = jax.random.split(k)
        bound = 1.0 / jnp.sqrt(jnp.float32(fan_in))
        w = jax.random.uniform(kw, (fan_in, fan_out), jnp.float32, -bound, bound)
        b = jax.random.uniform(kb, (1, fan_out), jnp.float32, -bound, bound)
        return w, b

    keys = jax.random.split(key, num_layers + 2)
    w_in, b_in = linear_init(keys[0], input_dim, hidden_dim)
    hid = [linear_init(keys[1 + i], hidden_dim, hidden_dim) for i in range(num_layers)]
    w_hidden = jnp.stack([w for (w, _) in hid], axis=0)        # [L, H, H]
    b_hidden = jnp.stack([b for (_, b) in hid], axis=0)        # [L, 1, H]
    w_out, b_out = linear_init(keys[-1], hidden_dim, output_dim)
    return {"w_in": w_in, "b_in": b_in,
            "w_hidden": w_hidden, "b_hidden": b_hidden,
            "w_out": w_out, "b_out": b_out}


def reference_forward_f32(x, params):
    h = x @ params["w_in"] + params["b_in"]
    for li in range(params["w_hidden"].shape[0]):
        h = jnp.maximum(h @ params["w_hidden"][li] + params["b_hidden"][li], 0.0)
    return h @ params["w_out"] + params["b_out"]


def reference_forward_bf16(x, params, dtype=jnp.bfloat16):
    """Same dtype policy as the kernel: bf16 MXU inputs, f32 accumulation/elementwise."""
    c = lambda a: a.astype(dtype)
    h = jnp.dot(c(x), c(params["w_in"]),
                preferred_element_type=jnp.float32) + params["b_in"]
    for li in range(params["w_hidden"].shape[0]):
        h = jnp.dot(c(h), c(params["w_hidden"][li]),
                    preferred_element_type=jnp.float32) + params["b_hidden"][li]
        h = jnp.maximum(h, 0.0)
    return jnp.dot(c(h), c(params["w_out"]),
                   preferred_element_type=jnp.float32) + params["b_out"]


if __name__ == "__main__":
    # Shapes consistent with the module: embeddings -> class logits (module default H=256).
    B, input_dim, hidden_dim, output_dim, num_layers = 256, 64, 256, 16, 2

    key = jax.random.PRNGKey(0)
    kx, kp = jax.random.split(key)
    x = jax.random.normal(kx, (B, input_dim), jnp.float32)
    raw_params = init_params(kp, input_dim, output_dim, hidden_dim, num_layers)
    prep = prepare_params(raw_params)  # pad + cast weights ONCE, reused by every call

    # Case 1: B=256 -> two 128-row tiles (grid=(2,)), no batch padding, both v7x cores used.
    out = jax.block_until_ready(embedding_classification_forward(x, prep))
    assert out.shape == (B, output_dim) and out.dtype == jnp.float32
    ref_bf16 = reference_forward_bf16(x, raw_params)
    ref_f32 = reference_forward_f32(x, raw_params)
    assert jnp.allclose(out, ref_bf16, atol=5e-3, rtol=5e-3), "mismatch vs bf16-policy reference"
    assert jnp.allclose(out, ref_f32, atol=1e-1, rtol=1e-1), "mismatch vs f32 reference"

    # Case 2: larger, non-tile-aligned batch -> 552-row tiles, 4 padded rows, grid=(2,).
    B2 = 1100
    x2 = jax.random.normal(jax.random.PRNGKey(1), (B2, input_dim), jnp.float32)
    out2 = jax.block_until_ready(embedding_classification_forward(x2, prep))
    assert out2.shape == (B2, output_dim)
    ref2 = reference_forward_bf16(x2, raw_params)
    assert jnp.allclose(out2, ref2, atol=5e-3, rtol=5e-3), "mismatch vs bf16-policy reference (tiled)"

    # Case 3: tiny batch -> single tile, grid=(1,).
    B3 = 16
    x3 = jax.random.normal(jax.random.PRNGKey(2), (B3, input_dim), jnp.float32)
    out3 = jax.block_until_ready(embedding_classification_forward(x3, prep))
    assert out3.shape == (B3, output_dim)
    ref3 = reference_forward_bf16(x3, raw_params)
    assert jnp.allclose(out3, ref3, atol=5e-3, rtol=5e-3), "mismatch vs bf16-policy reference (small)"

    print("KERNEL_OK")
</pallas_src>

<mosaic_0001>
module attributes {stable_mosaic.version = 11 : i64} {
  func.func @_mlp_kernel(%arg0: i32, %arg1: memref<128x64xf32, #tpu.memory_space<vmem>>, %arg2: memref<64x256xbf16, #tpu.memory_space<vmem>>, %arg3: memref<1x256xf32, #tpu.memory_space<vmem>>, %arg4: memref<2x256x256xbf16, #tpu.memory_space<vmem>>, %arg5: memref<2x1x256xf32, #tpu.memory_space<vmem>>, %arg6: memref<256x128xbf16, #tpu.memory_space<vmem>>, %arg7: memref<1x128xf32, #tpu.memory_space<vmem>>, %arg8: memref<128x16xf32, #tpu.memory_space<vmem>>) attributes {dimension_semantics = [#tpu.dimension_semantics<parallel>], iteration_bounds = array<i64: 2>, scalar_prefetch = 0 : i64, scratch_operands = 0 : i64, tpu.core_type = #tpu.core_type<tc>, window_params = [{transform_indices = @transform_0, window_bounds = array<i64: 128, 64>}, {pipeline_mode = #tpu.pipeline_mode<synchronous>, transform_indices = @transform_1, window_bounds = array<i64: 64, 256>}, {pipeline_mode = #tpu.pipeline_mode<synchronous>, transform_indices = @transform_2, window_bounds = array<i64: 1, 256>}, {pipeline_mode = #tpu.pipeline_mode<synchronous>, transform_indices = @transform_3, window_bounds = array<i64: 2, 256, 256>}, {pipeline_mode = #tpu.pipeline_mode<synchronous>, transform_indices = @transform_4, window_bounds = array<i64: 2, 1, 256>}, {pipeline_mode = #tpu.pipeline_mode<synchronous>, transform_indices = @transform_5, window_bounds = array<i64: 256, 128>}, {pipeline_mode = #tpu.pipeline_mode<synchronous>, transform_indices = @transform_6, window_bounds = array<i64: 1, 128>}, {transform_indices = @transform_7, window_bounds = array<i64: 128, 16>}]} {
    %c0 = arith.constant 0 : index
    %c0_0 = arith.constant 0 : index
    %0 = vector.load %arg1[%c0, %c0_0] : memref<128x64xf32, #tpu.memory_space<vmem>>, vector<128x64xf32>
    %1 = arith.truncf %0 : vector<128x64xf32> to vector<128x64xbf16>
    %c0_1 = arith.constant 0 : index
    %c0_2 = arith.constant 0 : index
    %2 = vector.load %arg3[%c0_1, %c0_2] : memref<1x256xf32, #tpu.memory_space<vmem>>, vector<1x256xf32>
    %c0_3 = arith.constant 0 : index
    %c0_4 = arith.constant 0 : index
    %c0_5 = arith.constant 0 : index
    %3 = vector.load %arg5[%c0_3, %c0_4, %c0_5] : memref<2x1x256xf32, #tpu.memory_space<vmem>>, vector<2x1x256xf32>
    %c0_6 = arith.constant 0 : index
    %c0_7 = arith.constant 0 : index
    %4 = vector.load %arg7[%c0_6, %c0_7] : memref<1x128xf32, #tpu.memory_space<vmem>>, vector<1x128xf32>
    %c0_8 = arith.constant 0 : index
    %c0_9 = arith.constant 0 : index
    %5 = vector.load %arg2[%c0_8, %c0_9] : memref<64x256xbf16, #tpu.memory_space<vmem>>, vector<64x256xbf16>
    %cst = arith.constant dense<0.000000e+00> : vector<128x256xf32>
    %6 = tpu.matmul %1, %5, %cst {dimension_numbers = #tpu.dot_dimension_numbers<[1], [0], [0], [1], [0, 0, 1, 1], [], []>} : vector<128x64xbf16>, vector<64x256xbf16>, vector<128x256xf32> -> vector<128x256xf32>
    %7 = vector.broadcast %2 : vector<1x256xf32> to vector<128x256xf32>
    %8 = arith.addf %6, %7 : vector<128x256xf32>
    %9 = arith.truncf %8 : vector<128x256xf32> to vector<128x256xbf16>
    %c0_10 = arith.constant 0 : index
    %c0_11 = arith.constant 0 : index
    %c0_12 = arith.constant 0 : index
    %10 = vector.load %arg4[%c0_10, %c0_11, %c0_12] : memref<2x256x256xbf16, #tpu.memory_space<vmem>>, vector<1x256x256xbf16>
    %11 = vector.shape_cast %10 : vector<1x256x256xbf16> to vector<256x256xbf16>
    %cst_13 = arith.constant dense<0.000000e+00> : vector<128x256xf32>
    %12 = tpu.matmul %9, %11, %cst_13 {dimension_numbers = #tpu.dot_dimension_numbers<[1], [0], [0], [1], [0, 0, 1, 1], [], []>} : vector<128x256xbf16>, vector<256x256xbf16>, vector<128x256xf32> -> vector<128x256xf32>
    %13 = vector.extract_strided_slice %3 {offsets = [0, 0, 0], sizes = [1, 1, 256], strides = [1, 1, 1]} : vector<2x1x256xf32> to vector<1x1x256xf32>
    %14 = vector.shape_cast %13 : vector<1x1x256xf32> to vector<1x256xf32>
    %15 = vector.broadcast %14 : vector<1x256xf32> to vector<128x256xf32>
    %16 = arith.addf %12, %15 : vector<128x256xf32>
    %cst_14 = arith.constant 0.000000e+00 : f32
    %17 = vector.broadcast %cst_14 : f32 to vector<128x256xf32>
    %18 = arith.maximumf %16, %17 : vector<128x256xf32>
    %19 = arith.truncf %18 : vector<128x256xf32> to vector<128x256xbf16>
    %c1 = arith.constant 1 : index
    %c0_15 = arith.constant 0 : index
    %c0_16 = arith.constant 0 : index
    %20 = vector.load %arg4[%c1, %c0_15, %c0_16] : memref<2x256x256xbf16, #tpu.memory_space<vmem>>, vector<1x256x256xbf16>
    %21 = vector.shape_cast %20 : vector<1x256x256xbf16> to vector<256x256xbf16>
    %cst_17 = arith.constant dense<0.000000e+00> : vector<128x256xf32>
    %22 = tpu.matmul %19, %21, %cst_17 {dimension_numbers = #tpu.dot_dimension_numbers<[1], [0], [0], [1], [0, 0, 1, 1], [], []>} : vector<128x256xbf16>, vector<256x256xbf16>, vector<128x256xf32> -> vector<128x256xf32>
    %23 = vector.extract_strided_slice %3 {offsets = [1, 0, 0], sizes = [1, 1, 256], strides = [1, 1, 1]} : vector<2x1x256xf32> to vector<1x1x256xf32>
    %24 = vector.shape_cast %23 : vector<1x1x256xf32> to vector<1x256xf32>
    %25 = vector.broadcast %24 : vector<1x256xf32> to vector<128x256xf32>
    %26 = arith.addf %22, %25 : vector<128x256xf32>
    %cst_18 = arith.constant 0.000000e+00 : f32
    %27 = vector.broadcast %cst_18 : f32 to vector<128x256xf32>
    %28 = arith.maximumf %26, %27 : vector<128x256xf32>
    %29 = arith.truncf %28 : vector<128x256xf32> to vector<128x256xbf16>
    %c0_19 = arith.constant 0 : index
    %c0_20 = arith.constant 0 : index
    %30 = vector.load %arg6[%c0_19, %c0_20] : memref<256x128xbf16, #tpu.memory_space<vmem>>, vector<256x128xbf16>
    %cst_21 = arith.constant dense<0.000000e+00> : vector<128x128xf32>
    %31 = tpu.matmul %29, %30, %cst_21 {dimension_numbers = #tpu.dot_dimension_numbers<[1], [0], [0], [1], [0, 0, 1, 1], [], []>} : vector<128x256xbf16>, vector<256x128xbf16>, vector<128x128xf32> -> vector<128x128xf32>
    %32 = vector.broadcast %4 : vector<1x128xf32> to vector<128x128xf32>
    %33 = arith.addf %31, %32 : vector<128x128xf32>
    %34 = vector.extract_strided_slice %33 {offsets = [0, 0], sizes = [128, 16], strides = [1, 1]} : vector<128x128xf32> to vector<128x16xf32>
    %c0_22 = arith.constant 0 : index
    %c0_23 = arith.constant 0 : index
    %35 = vector.load %arg8[%c0_22, %c0_23] : memref<128x16xf32, #tpu.memory_space<vmem>>, vector<128x16xf32>
    tpu.vector_store %arg8[%c0_22, %c0_23], %34 {strides = array<i32>} : memref<128x16xf32, #tpu.memory_space<vmem>>, vector<128x16xf32>,
    return
  }
  func.func @transform_0(%arg0: i32) -> (i32, i32) {
    %c0_i32 = arith.constant 0 : i32
    %c0_i32_0 = arith.constant 0 : i32
    return %arg0, %c0_i32 : i32, i32
  }
  func.func @transform_1(%arg0: i32) -> (i32, i32) {
    %c0_i32 = arith.constant 0 : i32
    %c0_i32_0 = arith.constant 0 : i32
    %c0_i32_1 = arith.constant 0 : i32
    return %c0_i32, %c0_i32_0 : i32, i32
  }
  func.func @transform_2(%arg0: i32) -> (i32, i32) {
    %c0_i32 = arith.constant 0 : i32
    %c0_i32_0 = arith.constant 0 : i32
    %c0_i32_1 = arith.constant 0 : i32
    return %c0_i32, %c0_i32_0 : i32, i32
  }
  func.func @transform_3(%arg0: i32) -> (i32, i32, i32) {
    %c0_i32 = arith.constant 0 : i32
    %c0_i32_0 = arith.constant 0 : i32
    %c0_i32_1 = arith.constant 0 : i32
    %c0_i32_2 = arith.constant 0 : i32
    return %c0_i32, %c0_i32_0, %c0_i32_1 : i32, i32, i32
  }
  func.func @transform_4(%arg0: i32) -> (i32, i32, i32) {
    %c0_i32 = arith.constant 0 : i32
    %c0_i32_0 = arith.constant 0 : i32
    %c0_i32_1 = arith.constant 0 : i32
    %c0_i32_2 = arith.constant 0 : i32
    return %c0_i32, %c0_i32_0, %c0_i32_1 : i32, i32, i32
  }
  func.func @transform_5(%arg0: i32) -> (i32, i32) {
    %c0_i32 = arith.constant 0 : i32
    %c0_i32_0 = arith.constant 0 : i32
    %c0_i32_1 = arith.constant 0 : i32
    return %c0_i32, %c0_i32_0 : i32, i32
  }
  func.func @transform_6(%arg0: i32) -> (i32, i32) {
    %c0_i32 = arith.constant 0 : i32
    %c0_i32_0 = arith.constant 0 : i32
    %c0_i32_1 = arith.constant 0 : i32
    return %c0_i32, %c0_i32_0 : i32, i32
  }
  func.func @transform_7(%arg0: i32) -> (i32, i32) {
    %c0_i32 = arith.constant 0 : i32
    %c0_i32_0 = arith.constant 0 : i32
    return %arg0, %c0_i32 : i32, i32
  }
}

</mosaic_0001>

<bundles_post_ra>
// kernel: tpu_custom_call.1
= control target key start
LH: loop header
LB: loop body
LE: loop exit
PB: predicated region body
PF: predicated region fallthrough
CT: control target
= control target key end

     0   :  { %12 = vsyncpa [#allocation3], 0  ;;  %s2004_s24 = smov 0   ;;  %s2374_s0 = inlined_call_operand.vmem [shape: f32[256,64], index: 0, kind: input, shape index: {}]   ;;  %s2375_s1 = inlined_call_operand.vmem [shape: bf16[64,256], index: 1, kind: input, shape index: {}]   ;;  %s2376_s2 = inlined_call_operand.vmem [shape: f32[1,256], index: 2, kind: input, shape index: {}]   ;;  %s2377_s3 = inlined_call_operand.hbm [shape: bf16[2,256,256], index: 3, kind: input, shape index: {}]   ;;  %s2378_s4 = inlined_call_operand.vmem [shape: f32[2,1,256], index: 4, kind: input, shape index: {}]   ;;  %s2379_s5 = inlined_call_operand.vmem [shape: bf16[256,128], index: 5, kind: input, shape index: {}]   ;;  %s2380_s6 = inlined_call_operand.vmem [shape: f32[1,128], index: 6, kind: input, shape index: {}]   ;;  %s2381_s7 = inlined_call_operand.vmem [shape: f32[256,16], index: 7, kind: output, shape index: {}]  }
   0x1 LB: > { %s1584_s25 = sadd.s32 4294967295, %s1958_s24   ;;  %p1586_p0 = scmp.ge.s32.totalorder %s1958_s24, 1  ;;  %s1958_s24 = sphi %s2004_s24, %s18_s24  }
   0x2   : > { %p201_p1 = scmp.lt.s32.totalorder %s1958_s24, 3  ;;  %s1960_s26 = smov [#allocation2]  }
   0x3   : > { %s219_s27 = sshll.u32 %s1960_s26, 4  ;;  %p2018_p3 = scmp.eq.s32.totalorder %s1584_s25, 0  ;;  %s220_s27 = int_to_ptr.vmem [resolvable:$true] %s219_s27 }
   0x4   : > { %p2012_p2 = pnand %p1586_p0, %p201_p1  ;;  %s1920_s10 = scalar_lea.hbm %s2377_s3, 8192 }
   0x5   : > { %s2386_s29 = scalar_select %p2018_p3, 1, 0 }
   0x6   : > { %s2385_s28 = scalar_select %p2012_p2, 1, 0 }
   0x7   : > { %p1778_p4 = pneg %p2012_p2  ;;  %p1921_p6 = scmp.ne.s32.totalorder %s2377_s3, %s1920_s10 }
   0x8   : > { %p1927_p10 = scmp.lt.u32.totalorder %s1920_s10, %s2377_s3 }
   0x9   : > { %p2026_p5 = pnand %p2018_p3, %p1778_p4 }
   0xb   : > { %p1922_p7 = pneg %p2026_p5 }
   0xd   : > { %p1923_p8 = pnand %p1922_p7, %p1921_p6 }
   0xf   : > { %p1924_p9 = pneg %p1923_p8 }
  0x11   : > { %p1929_p11 = pnand %p1927_p10, %p1924_p9 }
  0x13   : > { %1932 = shalt.err (!%p1929_p11)
}
  0x14   : > { %s1933_s15 = scalar_lea.vmem %s220_s27, 8192  ;;  %p1941_p1 = scmp.lt.s32.totalorder %s220_s27, %s220_s27 }
  0x15   : > { %p1934_p12 = scmp.ne.s32.totalorder %s220_s27, %s1933_s15  ;;  %p1942_p4 = scmp.lt.s32.totalorder %s1933_s15, %s1933_s15 }
  0x17   : > { %p1936_p13 = pnand %p1934_p12, %p1922_p7  ;;  %p1943_p3 = por %p1942_p4, %p1941_p1 }
  0x19   : > { %p1937_p0 = pneg %p1936_p13 }
  0x1b   : > { %p1944_p2 = pnand %p1943_p3, %p1937_p0 }
  0x1d   : > { %1947 = shalt.err (!%p1944_p2)
}
  0x1e   : > { %s1961_s16 = smov 128   ;;  %s1962_s17 = smov 8  }
  0x1f   : > { %1781 = dma.hbm_to_vmem [thread:$0]  (!%p2026_p5), %s2377_s3, 8192, %s220_s27, [#allocation3], %s1961_s16, %s1961_s16, %s1962_s17  }
  0x20   : > { %p2388_p6 = scmp.ne.s32.totalorder %s2385_s28, 0 }
  0x21   : > { %p2389_p8 = scmp.ne.s32.totalorder (!%p2388_p6), %s2386_s29, 0 }
  0x22   : > { %253 = sbr.rel (%p2388_p6) target bundleno = 999 (0x3e7), region = 48 }
  0x29   : > { %1953 = dma.done.wait (%p2389_p8), [#allocation3], 8192  }
  0x2a   : > { %1955 = vsyncadd (%p2389_p8), [#allocation3], 4294959104  ;;  %s1591_s20 = sshll.u32 %s1584_s25, 4  ;;  %v1963_v0 = vmov 0   ;;  %v1796_v1 = vld [vmem:[%s2375_s1 + $0x4] ss:$8 sps:$4 sm:$0xff]  }
  0x2b   : > { %442 = vmatprep.mubr.bf16.mxu0 %v1963_v0  ;;  %p286_p2 = scmp.lt.s32.totalorder %s1591_s20, 31  ;;  %v1798_v2 = vld [vmem:[%s2375_s1] ss:$8 sps:$4 sm:$0xff]   ;;  %410 = vmatprep.subr.bf16.mxu0 %v1796_v1  ;;  %v1799_v3 = vld [vmem:[%s2375_s1 + $0x14] ss:$8 sps:$4 sm:$0xff]   ;;  %vm385_vm0 = vcmask 523264  }
  0x2c   : > { %411 = vmatpush1.bf16.msra.mxu0 %v1798_v2  ;;  %v1801_v4 = vld [vmem:[%s2375_s1 + $0x10] ss:$8 sps:$4 sm:$0xff]   ;;  %v1802_v5 = vld [vmem:[%s2375_s1 + $0x24] ss:$8 sps:$4 sm:$0xff]   ;;  %v1804_v6 = vld [vmem:[%s2375_s1 + $0x20] ss:$8 sps:$4 sm:$0xff]  }
  0x2d   : > { %s2391_s20 = smov (!%p286_p2, %s1591_s20), 31  ;;  %412 = vmatprep.subr.bf16.mxu0 %v1799_v3  ;;  %v1805_v7 = vld [vmem:[%s2375_s1 + $0x34] ss:$8 sps:$4 sm:$0xff]   ;;  %v1807_v8 = vld [vmem:[%s2375_s1 + $0x30] ss:$8 sps:$4 sm:$0xff]   ;;  %vm1499_vm1 = vcmask 130048  }
  0x2e   : > { %s1592_s9 = sshll.u32 %s2391_s20, 3  ;;  %v1808_v11 = vld [vmem:[#allocation2 + $0x4] ss:$8 sps:$4 sm:$0xff]   ;;  %v1810_v12 = vld [vmem:[#allocation2] ss:$8 sps:$4 sm:$0xff]  }
  0x2f   : > { %s2081_s14 = scalar_lea.vmem %s2374_s0, %s1592_s9  ;;  %v1811_v13 = vld [vmem:[#allocation2 + $0x14] ss:$8 sps:$4 sm:$0xff]   ;;  %742 = vmatprep.subr.bf16.mxu1 %v1808_v11  ;;  %v1813_v15 = vld [vmem:[#allocation2 + $0x10] ss:$8 sps:$4 sm:$0xff]   ;;  %v1814_v16 = vld [vmem:[#allocation2 + $0x24] ss:$8 sps:$4 sm:$0xff]   ;;  %s2321_s22 = scalar_lea.vmem %s2381_s7, %s1592_s9 }
  0x30   : > { %413 = vmatpush1.bf16.msra.mxu0 %v1801_v4  ;;  %v298_v9 = vld [vmem:[%s2081_s14] sm:$0xff]  ;;  %v299_v10 = vld [vmem:[%s2081_s14 + $0x8] sm:$0xff]  ;;  %743 = vmatpush1.bf16.msra.mxu1 %v1810_v12  ;;  %v300_v17 = vld [vmem:[%s2081_s14 + $0x10] sm:$0xff] }
  0x31   : > { %414 = vmatprep.subr.bf16.mxu0 %v1802_v5  ;;  %v314_v14 = vpack.c.bf16 %v299_v10, %v298_v9  ;;  %744 = vmatprep.subr.bf16.mxu1 %v1811_v13  ;;  %v1816_v18 = vld [vmem:[#allocation2 + $0x20] ss:$8 sps:$4 sm:$0xff]   ;;  %v301_v19 = vld [vmem:[%s2081_s14 + $0x18] sm:$0xff]  ;;  %v1820_v23 = vld [vmem:[#allocation2 + $0x44] ss:$8 sps:$4 sm:$0xff]  }
  0x32   : > { %v1817_v20 = vld [vmem:[#allocation2 + $0x34] ss:$8 sps:$4 sm:$0xff]   ;;  %v315_v21 = vpack.c.bf16 %v301_v19, %v300_v17  ;;  %v1819_v22 = vld [vmem:[#allocation2 + $0x30] ss:$8 sps:$4 sm:$0xff]   ;;  %v302_v24 = vld [vmem:[%s2081_s14 + $0x20] sm:$0xff] }
  0x33   : > { %v1822_v25 = vld [vmem:[#allocation2 + $0x40] ss:$8 sps:$4 sm:$0xff]   ;;  %v1823_v27 = vld [vmem:[#allocation2 + $0x54] ss:$8 sps:$4 sm:$0xff]   ;;  %v1825_v28 = vld [vmem:[#allocation2 + $0x50] ss:$8 sps:$4 sm:$0xff]  }
  0x34   : > { %415 = vmatpush1.bf16.msra.mxu0 %v1804_v6  ;;  %745 = vmatpush1.bf16.msra.mxu1 %v1813_v15  ;;  %v303_v26 = vld [vmem:[%s2081_s14 + $0x28] sm:$0xff]  ;;  %v304_v32 = vld [vmem:[%s2081_s14 + $0x30] sm:$0xff]  ;;  %v305_v33 = vld [vmem:[%s2081_s14 + $0x38] sm:$0xff] }
  0x35   : > { %416 = vmatprep.subr.bf16.mxu0 %v1805_v7  ;;  %746 = vmatprep.subr.bf16.mxu1 %v1814_v16  ;;  %v1826_v29 = vld [vmem:[#allocation2 + $0x64] ss:$8 sps:$4 sm:$0xff]   ;;  %v316_v30 = vpack.c.bf16 %v303_v26, %v302_v24  ;;  %v1828_v31 = vld [vmem:[#allocation2 + $0x60] ss:$8 sps:$4 sm:$0xff]   ;;  %v1829_v34 = vld [vmem:[#allocation2 + $0x74] ss:$8 sps:$4 sm:$0xff]   ;;  %v317_v37 = vpack.c.bf16 %v305_v33, %v304_v32 }
  0x36   : > { %v1831_v35 = vld [vmem:[#allocation2 + $0x70] ss:$8 sps:$4 sm:$0xff]   ;;  %v1832_v36 = vld [vmem:[#allocation2 + $0x84] ss:$8 sps:$4 sm:$0xff]   ;;  %v1834_v38 = vld [vmem:[#allocation2 + $0x80] ss:$8 sps:$4 sm:$0xff]  }
  0x37   : > { %v306_v39 = vld [vmem:[%s2081_s14 + $0x40] sm:$0xff]  ;;  %v307_v40 = vld [vmem:[%s2081_s14 + $0x48] sm:$0xff]  ;;  %v1835_v41 = vld [vmem:[#allocation2 + $0x94] ss:$8 sps:$4 sm:$0xff]  }
  0x38   : > { %417 = vmatpush1.bf16.msra.mxu0 %v1807_v8  ;;  %747 = vmatpush1.bf16.msra.mxu1 %v1816_v18  ;;  %v1837_v42 = vld [vmem:[#allocation2 + $0x90] ss:$8 sps:$4 sm:$0xff]   ;;  %v1838_v43 = vld [vmem:[#allocation2 + $0xa4] ss:$8 sps:$4 sm:$0xff]   ;;  %v318_v44 = vpack.c.bf16 %v307_v40, %v306_v39  ;;  %v1840_v45 = vld [vmem:[#allocation2 + $0xa0] ss:$8 sps:$4 sm:$0xff]  }
  0x39   : > { %748 = vmatprep.subr.bf16.mxu1 %v1817_v20  ;;  %v308_v46 = vld [vmem:[%s2081_s14 + $0x50] sm:$0xff]  ;;  %v309_v47 = vld [vmem:[%s2081_s14 + $0x58] sm:$0xff]  ;;  %v1844_v51 = vld [vmem:[#allocation2 + $0xc4] ss:$8 sps:$4 sm:$0xff]  }
  0x3a   : > { %v1841_v48 = vld [vmem:[#allocation2 + $0xb4] ss:$8 sps:$4 sm:$0xff]   ;;  %v319_v49 = vpack.c.bf16 %v309_v47, %v308_v46  ;;  %v1843_v50 = vld [vmem:[#allocation2 + $0xb0] ss:$8 sps:$4 sm:$0xff]   ;;  %v1846_v52 = vld [vmem:[#allocation2 + $0xc0] ss:$8 sps:$4 sm:$0xff]  }
  0x3b   : > { %1603 = vmatmul.mubr.msk.bf16.vlgmr.msra.gmra.mrb[0].mxu0 %vm385_vm0, %v314_v14  ;;  %v310_v53 = vld [vmem:[%s2081_s14 + $0x60] sm:$0xff]  ;;  %v311_v54 = vld [vmem:[%s2081_s14 + $0x68] sm:$0xff]  ;;  %v1847_v55 = vld [vmem:[#allocation2 + $0xd4] ss:$8 sps:$4 sm:$0xff]  }
  0x3c   : > { %452 = vmatprep.mubr.bf16.mxu0 %v1963_v0  ;;  %749 = vmatpush1.bf16.msra.mxu1 %v1819_v22  ;;  %v320_v56 = vpack.c.bf16 %v311_v54, %v310_v53  ;;  %v1849_v57 = vld [vmem:[#allocation2 + $0xd0] ss:$8 sps:$4 sm:$0xff]   ;;  %v1850_v61 = vld [vmem:[#allocation2 + $0xe4] ss:$8 sps:$4 sm:$0xff]   ;;  %v1852_v62 = vld [vmem:[#allocation2 + $0xe0] ss:$8 sps:$4 sm:$0xff]  }
  0x3d   : > { %750 = vmatprep.subr.bf16.mxu1 %v1820_v23  ;;  %v312_v58 = vld [vmem:[%s2081_s14 + $0x70] sm:$0xff]  ;;  %v313_v59 = vld [vmem:[%s2081_s14 + $0x78] sm:$0xff]  ;;  %v1856_v2 = vld [vmem:[#allocation2 + $0x100] ss:$8 sps:$4 sm:$0xff]  }
  0x3e   : > { %v321_v60 = vpack.c.bf16 %v313_v59, %v312_v58  ;;  %v1853_v63 = vld [vmem:[#allocation2 + $0xf4] ss:$8 sps:$4 sm:$0xff]   ;;  %v1855_v1 = vld [vmem:[#allocation2 + $0xf0] ss:$8 sps:$4 sm:$0xff]   ;;  %v1858_v3 = vld [vmem:[#allocation2 + $0x104] ss:$8 sps:$4 sm:$0xff]  }
  0x3f   : > { %v1861_v4 = vld [vmem:[#allocation2 + $0x114] ss:$8 sps:$4 sm:$0xff]   ;;  %1107 = vmatprep.subr.bf16.mxu0 %v1858_v3  ;;  %v1859_v5 = vld [vmem:[#allocation2 + $0x110] ss:$8 sps:$4 sm:$0xff]   ;;  %v1862_v6 = vld [vmem:[#allocation2 + $0x120] ss:$8 sps:$4 sm:$0xff]  }
  0x40   : > { %751 = vmatpush1.bf16.msra.mxu1 %v1822_v25  ;;  %1108 = vmatpush1.bf16.msra.mxu0 %v1856_v2  ;;  %v1867_v7 = vld [vmem:[#allocation2 + $0x134] ss:$8 sps:$4 sm:$0xff]   ;;  %v1865_v8 = vld [vmem:[#allocation2 + $0x130] ss:$8 sps:$4 sm:$0xff]   ;;  %v1870_v9 = vld [vmem:[#allocation2 + $0x144] ss:$8 sps:$4 sm:$0xff]  }
  0x41   : > { %752 = vmatprep.subr.bf16.mxu1 %v1823_v27  ;;  %1109 = vmatprep.subr.bf16.mxu0 %v1861_v4  ;;  %v1868_v10 = vld [vmem:[#allocation2 + $0x140] ss:$8 sps:$4 sm:$0xff]   ;;  %v1873_v11 = vld [vmem:[#allocation2 + $0x154] ss:$8 sps:$4 sm:$0xff]   ;;  %v1871_v12 = vld [vmem:[#allocation2 + $0x150] ss:$8 sps:$4 sm:$0xff]  }
  0x42   : > { %v1876_v13 = vld [vmem:[#allocation2 + $0x164] ss:$8 sps:$4 sm:$0xff]   ;;  %v1874_v14 = vld [vmem:[#allocation2 + $0x160] ss:$8 sps:$4 sm:$0xff]   ;;  %v1879_v15 = vld [vmem:[#allocation2 + $0x174] ss:$8 sps:$4 sm:$0xff]  }
  0x43   : > { %1604 = vmatmul.mubr.msk.bf16.gmra.mrb[4].mxu0 %vm385_vm0, %v315_v21  ;;  %v1877_v16 = vld [vmem:[#allocation2 + $0x170] ss:$8 sps:$4 sm:$0xff]   ;;  %v1882_v17 = vld [vmem:[#allocation2 + $0x184] ss:$8 sps:$4 sm:$0xff]   ;;  %v1880_v18 = vld [vmem:[#allocation2 + $0x180] ss:$8 sps:$4 sm:$0xff]  }
  0x44   : > { %462 = vmatprep.mubr.bf16.mxu0 %v1963_v0  ;;  %753 = vmatpush1.bf16.msra.mxu1 %v1825_v28  ;;  %v1885_v19 = vld [vmem:[#allocation2 + $0x194] ss:$8 sps:$4 sm:$0xff]   ;;  %v1883_v20 = vld [vmem:[#allocation2 + $0x190] ss:$8 sps:$4 sm:$0xff]   ;;  %v1888_v21 = vld [vmem:[#allocation2 + $0x1a4] ss:$8 sps:$4 sm:$0xff]   ;;  %v335_v28 = vlaneseq }
  0x45   : > { %754 = vmatprep.subr.bf16.mxu1 %v1826_v29  ;;  %1110 = vmatpush1.bf16.msra.mxu0 %v1859_v5  ;;  %v1886_v22 = vld [vmem:[#allocation2 + $0x1a0] ss:$8 sps:$4 sm:$0xff]   ;;  %v1891_v23 = vld [vmem:[#allocation2 + $0x1b4] ss:$8 sps:$4 sm:$0xff]   ;;  %v1889_v24 = vld [vmem:[#allocation2 + $0x1b0] ss:$8 sps:$4 sm:$0xff]  }
  0x46   : > { %v1894_v25 = vld [vmem:[#allocation2 + $0x1c4] ss:$8 sps:$4 sm:$0xff]   ;;  %v1892_v26 = vld [vmem:[#allocation2 + $0x1c0] ss:$8 sps:$4 sm:$0xff]   ;;  %v1897_v27 = vld [vmem:[#allocation2 + $0x1d4] ss:$8 sps:$4 sm:$0xff]  }
  0x47   : > { %v1895_v29 = vld [vmem:[#allocation2 + $0x1d0] ss:$8 sps:$4 sm:$0xff]   ;;  %v322_v32 = vld [vmem:[%s2376_s2] sm:$0x3] }
  0x48   : > { %755 = vmatpush1.bf16.msra.mxu1 %v1828_v31 }
  0x49   : > { %756 = vmatprep.subr.bf16.mxu1 %v1829_v34 }
  0x4b   : > { %1605 = vmatmul.mubr.msk.bf16.gmra.mrb[8].mxu0 %vm385_vm0, %v316_v30  ;;  %v336_v30 = vshrl.u32 %v335_v28, 7 }
  0x4c   : > { %472 = vmatprep.mubr.bf16.mxu0 %v1963_v0  ;;  %757 = vmatpush1.bf16.msra.mxu1 %v1831_v35 }
  0x4d   : > { %758 = vmatprep.subr.bf16.mxu1 %v1832_v36  ;;  %v2120_v31 = vsub.s32 0, %v336_v30  ;;  %v2125_v33 = vsub.s32 1, %v336_v30 }
  0x4f   : > { %v2128_v34 = vrot.slane %v322_v32, %v2120_v31  ;;  %v2131_v36 = vrot.slane %v322_v32, %v2125_v33 }
  0x50   : > { %759 = vmatpush1.bf16.msra.mxu1 %v1834_v38 }
  0x51   : > { %760 = vmatprep.subr.bf16.mxu1 %v1835_v41 }
  0x53   : > { %1606 = vmatmul.mubr.msk.bf16.gmra.mrb[12].mxu0 %vm385_vm0, %v317_v37 }
  0x54   : > { %482 = vmatprep.mubr.bf16.mxu0 %v1963_v0  ;;  %761 = vmatpush1.bf16.msra.mxu1 %v1837_v42 }
  0x55   : > { %762 = vmatprep.subr.bf16.mxu1 %v1838_v43 }
  0x58   : > { %763 = vmatpush1.bf16.msra.mxu1 %v1840_v45 }
  0x59   : > { %764 = vmatprep.subr.bf16.mxu1 %v1841_v48 }
  0x5b   : > { %1607 = vmatmul.mubr.msk.bf16.gmra.mrb[16].mxu0 %vm385_vm0, %v318_v44 }
  0x5c   : > { %492 = vmatprep.mubr.bf16.mxu0 %v1963_v0  ;;  %765 = vmatpush1.bf16.msra.mxu1 %v1843_v50 }
  0x5d   : > { %766 = vmatprep.subr.bf16.mxu1 %v1844_v51 }
  0x60   : > { %767 = vmatpush1.bf16.msra.mxu1 %v1846_v52 }
  0x61   : > { %768 = vmatprep.subr.bf16.mxu1 %v1847_v55 }
  0x63   : > { %1608 = vmatmul.mubr.msk.bf16.gmra.mrb[20].mxu0 %vm385_vm0, %v319_v49 }
  0x64   : > { %502 = vmatprep.mubr.bf16.mxu0 %v1963_v0  ;;  %769 = vmatpush1.bf16.msra.mxu1 %v1849_v57 }
  0x65   : > { %770 = vmatprep.subr.bf16.mxu1 %v1850_v61 }
  0x68   : > { %771 = vmatpush1.bf16.msra.mxu1 %v1852_v62 }
  0x69   : > { %772 = vmatprep.subr.bf16.mxu1 %v1853_v63 }
  0x6b   : > { %1609 = vmatmul.mubr.msk.bf16.gmra.mrb[24].mxu0 %vm385_vm0, %v320_v56 }
  0x6c   : > { %512 = vmatprep.mubr.bf16.mxu0 %v1963_v0  ;;  %773 = vmatpush1.bf16.msra.mxu1 %v1855_v1  ;;  %v1864_v0 = vld [vmem:[#allocation2 + $0x124] ss:$8 sps:$4 sm:$0xff]  }
  0x6d   : > { %1111 = vmatprep.subr.bf16.mxu0 %v1864_v0 }
  0x6e   : > { %1112 = vmatpush1.bf16.msra.mxu0 %v1862_v6 }
  0x6f   : > { %1113 = vmatprep.subr.bf16.mxu0 %v1867_v7 }
  0x72   : > { %1114 = vmatpush1.bf16.msra.mxu0 %v1865_v8 }
  0x73   : > { %1610 = vmatmul.mubr.msk.bf16.gmra.mrb[28].mxu0 %vm385_vm0, %v321_v60  ;;  %1115 = vmatprep.subr.bf16.mxu0 %v1870_v9 }
  0x76   : > { %1116 = vmatpush1.bf16.msra.mxu0 %v1868_v10 }
  0x77   : > { %1117 = vmatprep.subr.bf16.mxu0 %v1873_v11 }
  0x7a   : > { %1118 = vmatpush1.bf16.msra.mxu0 %v1871_v12 }
  0x7b   : > { %1119 = vmatprep.subr.bf16.mxu0 %v1876_v13 }
  0x7e   : > { %1120 = vmatpush1.bf16.msra.mxu0 %v1874_v14 }
  0x7f   : > { %1121 = vmatprep.subr.bf16.mxu0 %v1879_v15 }
  0x82   : > { %1122 = vmatpush1.bf16.msra.mxu0 %v1877_v16 }
  0x83   : > { %1123 = vmatprep.subr.bf16.mxu0 %v1882_v17 }
  0x86   : > { %1124 = vmatpush1.bf16.msra.mxu0 %v1880_v18 }
  0x87   : > { %1125 = vmatprep.subr.bf16.mxu0 %v1885_v19 }
  0x8a   : > { %1126 = vmatpush1.bf16.msra.mxu0 %v1883_v20 }
  0x8b   : > { %1127 = vmatprep.subr.bf16.mxu0 %v1888_v21 }
  0x8e   : > { %1128 = vmatpush1.bf16.msra.mxu0 %v1886_v22 }
  0x8f   : > { %1129 = vmatprep.subr.bf16.mxu0 %v1891_v23 }
  0x92   : > { %1130 = vmatpush1.bf16.msra.mxu0 %v1889_v24 }
  0x93   : > { %1131 = vmatprep.subr.bf16.mxu0 %v1894_v25 }
  0x96   : > { %1132 = vmatpush1.bf16.msra.mxu0 %v1892_v26 }
  0x97   : > { %1133 = vmatprep.subr.bf16.mxu0 %v1897_v27 }
  0x9a   : > { %1134 = vmatpush1.bf16.msra.mxu0 %v1895_v29 }
 0x10e   : > { %v444_v35 = vpop.f32.mrb[0].mxu0 }
 0x10f   : > { %v446_v37 = vpop.f32.mrb[1].mxu0  ;;  %v445_v39 = vadd.f32 %v444_v35, %v2128_v34 }
 0x110   : > { %v448_v38 = vpop.f32.mrb[2].mxu0  ;;  %v447_v42 = vadd.f32 %v446_v37, %v2131_v36 }
 0x111   : > { %v449_v40 = vadd.f32 %v448_v38, %v2128_v34  ;;  %v450_v41 = vpop.f32.mrb[3].mxu0 }
 0x112   : > { %v451_v43 = vadd.f32 %v450_v41, %v2131_v36 }
 0x113   : > { %v523_v44 = vpack.c.bf16 %v449_v40, %v445_v39 }
 0x114   : > { %v524_v45 = vpack.c.bf16 %v451_v43, %v447_v42 }
 0x116   : > { %v454_v46 = vpop.f32.mrb[4].mxu0  ;;  %774 = vmatprep.mubr.bf16.mxu1 %v524_v45 }
 0x117   : > { %v456_v47 = vpop.f32.mrb[5].mxu0  ;;  %775 = vmatmul.mubr.bf16.vlgmr.msra.gmra.mrb[0].mxu1 %v523_v44  ;;  %v455_v49 = vadd.f32 %v454_v46, %v2128_v34 }
 0x118   : > { %v458_v48 = vpop.f32.mrb[6].mxu0  ;;  %v457_v52 = vadd.f32 %v456_v47, %v2131_v36 }
 0x119   : > { %v459_v50 = vadd.f32 %v458_v48, %v2128_v34  ;;  %v460_v51 = vpop.f32.mrb[7].mxu0 }
 0x11a   : > { %v461_v53 = vadd.f32 %v460_v51, %v2131_v36 }
 0x11b   : > { %v525_v54 = vpack.c.bf16 %v459_v50, %v455_v49 }
 0x11c   : > { %v526_v55 = vpack.c.bf16 %v461_v53, %v457_v52 }
 0x11e   : > { %v464_v56 = vpop.f32.mrb[8].mxu0  ;;  %784 = vmatprep.mubr.bf16.mxu1 %v526_v55 }
 0x11f   : > { %v466_v57 = vpop.f32.mrb[9].mxu0  ;;  %785 = vmatmul.mubr.bf16.gmra.mrb[4].mxu1 %v525_v54  ;;  %v465_v59 = vadd.f32 %v464_v56, %v2128_v34  ;;  %v1900_v56 = vld [vmem:[#allocation2 + $0x1e4] ss:$8 sps:$4 sm:$0xff]  }
 0x120   : > { %v468_v58 = vpop.f32.mrb[10].mxu0  ;;  %v467_v62 = vadd.f32 %v466_v57, %v2131_v36  ;;  %v1898_v57 = vld [vmem:[#allocation2 + $0x1e0] ss:$8 sps:$4 sm:$0xff]   ;;  %1135 = vmatprep.subr.bf16.mxu0 %v1900_v56 }
 0x121   : > { %v469_v60 = vadd.f32 %v468_v58, %v2128_v34  ;;  %v470_v61 = vpop.f32.mrb[11].mxu0  ;;  %1136 = vmatpush1.bf16.msra.mxu0 %v1898_v57  ;;  %v1903_v58 = vld [vmem:[#allocation2 + $0x1f4] ss:$8 sps:$4 sm:$0xff]  }
 0x122   : > { %v471_v63 = vadd.f32 %v470_v61, %v2131_v36  ;;  %1137 = vmatprep.subr.bf16.mxu0 %v1903_v58  ;;  %v1907_v61 = vld [vmem:[%s2379_s5 + $0x8] sm:$0xff]  }
 0x123   : > { %v527_v1 = vpack.c.bf16 %v469_v60, %v465_v59  ;;  %v1901_v59 = vld [vmem:[#allocation2 + $0x1f0] ss:$8 sps:$4 sm:$0xff]   ;;  %v1906_v60 = vld [vmem:[%s2379_s5 + $0x48] sm:$0xff]  }
 0x124   : > { %v528_v2 = vpack.c.bf16 %v471_v63, %v467_v62  ;;  %v1908_v62 = vld [vmem:[%s2379_s5 + $0x50] sm:$0xff]  }
 0x125   : > { %1138 = vmatpush1.bf16.msra.mxu0 %v1901_v59  ;;  %v1909_v63 = vld [vmem:[%s2379_s5 + $0x10] sm:$0xff]  }
 0x126   : > { %v474_v3 = vpop.f32.mrb[12].mxu0  ;;  %794 = vmatprep.mubr.bf16.mxu1 %v528_v2  ;;  %v2189_v2 = vld [vmem:[%s2379_s5 + $0x18] sm:$0xff]  }
 0x127   : > { %v476_v4 = vpop.f32.mrb[13].mxu0  ;;  %795 = vmatmul.mubr.bf16.gmra.mrb[8].mxu1 %v527_v1  ;;  %v475_v0 = vadd.f32 %v474_v3, %v2128_v34  ;;  %v1910_v1 = vld [vmem:[%s2379_s5 + $0x58] sm:$0xff]   ;;  %v2194_v3 = vld [vmem:[%s2379_s5 + $0x60] sm:$0xff]  }
 0x128   : > { %v478_v5 = vpop.f32.mrb[14].mxu0  ;;  %v477_v8 = vadd.f32 %v476_v4, %v2131_v36  ;;  %v2201_v4 = vld [vmem:[%s2379_s5 + $0x20] sm:$0xff]  }
 0x129   : > { %v479_v6 = vadd.f32 %v478_v5, %v2128_v34  ;;  %v480_v7 = vpop.f32.mrb[15].mxu0  ;;  %v2206_v5 = vld [vmem:[%s2379_s5 + $0x68] sm:$0xff]  }
 0x12a   : > { %v481_v9 = vadd.f32 %v480_v7, %v2131_v36 }
 0x12b   : > { %v529_v10 = vpack.c.bf16 %v479_v6, %v475_v0  ;;  %v323_v0 = vld [vmem:[%s2378_s4] sm:$0x3] }
 0x12c   : > { %v530_v11 = vpack.c.bf16 %v481_v9, %v477_v8  ;;  %v2214_v6 = vrot.slane %v323_v0, %v2120_v31  ;;  %v2217_v7 = vrot.slane %v323_v0, %v2125_v33 }
 0x12e   : > { %v484_v12 = vpop.f32.mrb[16].mxu0  ;;  %804 = vmatprep.mubr.bf16.mxu1 %v530_v11 }
 0x12f   : > { %v486_v13 = vpop.f32.mrb[17].mxu0  ;;  %805 = vmatmul.mubr.bf16.gmra.mrb[12].mxu1 %v529_v10  ;;  %v485_v15 = vadd.f32 %v484_v12, %v2128_v34 }
 0x130   : > { %v488_v14 = vpop.f32.mrb[18].mxu0  ;;  %v487_v18 = vadd.f32 %v486_v13, %v2131_v36 }
 0x131   : > { %v489_v16 = vadd.f32 %v488_v14, %v2128_v34  ;;  %v490_v17 = vpop.f32.mrb[19].mxu0 }
 0x132   : > { %v491_v19 = vadd.f32 %v490_v17, %v2131_v36 }
 0x133   : > { %v531_v20 = vpack.c.bf16 %v489_v16, %v485_v15 }
 0x134   : > { %v532_v21 = vpack.c.bf16 %v491_v19, %v487_v18 }
 0x136   : > { %v494_v22 = vpop.f32.mrb[20].mxu0  ;;  %814 = vmatprep.mubr.bf16.mxu1 %v532_v21 }
 0x137   : > { %v496_v23 = vpop.f32.mrb[21].mxu0  ;;  %815 = vmatmul.mubr.bf16.gmra.mrb[16].mxu1 %v531_v20  ;;  %v495_v25 = vadd.f32 %v494_v22, %v2128_v34 }
 0x138   : > { %v498_v24 = vpop.f32.mrb[22].mxu0  ;;  %v497_v28 = vadd.f32 %v496_v23, %v2131_v36 }
 0x139   : > { %v499_v26 = vadd.f32 %v498_v24, %v2128_v34  ;;  %v500_v27 = vpop.f32.mrb[23].mxu0 }
 0x13a   : > { %v501_v29 = vadd.f32 %v500_v27, %v2131_v36 }
 0x13b   : > { %v533_v30 = vpack.c.bf16 %v499_v26, %v495_v25 }
 0x13c   : > { %v534_v32 = vpack.c.bf16 %v501_v29, %v497_v28 }
 0x13e   : > { %v504_v35 = vpop.f32.mrb[24].mxu0  ;;  %824 = vmatprep.mubr.bf16.mxu1 %v534_v32 }
 0x13f   : > { %v506_v37 = vpop.f32.mrb[25].mxu0  ;;  %825 = vmatmul.mubr.bf16.gmra.mrb[20].mxu1 %v533_v30  ;;  %v505_v39 = vadd.f32 %v504_v35, %v2128_v34 }
 0x140   : > { %v508_v38 = vpop.f32.mrb[26].mxu0  ;;  %v507_v42 = vadd.f32 %v506_v37, %v2131_v36 }
 0x141   : > { %v509_v40 = vadd.f32 %v508_v38, %v2128_v34  ;;  %v510_v41 = vpop.f32.mrb[27].mxu0 }
 0x142   : > { %v511_v43 = vadd.f32 %v510_v41, %v2131_v36 }
 0x143   : > { %v535_v44 = vpack.c.bf16 %v509_v40, %v505_v39 }
 0x144   : > { %v536_v45 = vpack.c.bf16 %v511_v43, %v507_v42 }
 0x146   : > { %v514_v46 = vpop.f32.mrb[28].mxu0  ;;  %834 = vmatprep.mubr.bf16.mxu1 %v536_v45 }
 0x147   : > { %v516_v47 = vpop.f32.mrb[29].mxu0  ;;  %835 = vmatmul.mubr.bf16.gmra.mrb[24].mxu1 %v535_v44  ;;  %v515_v49 = vadd.f32 %v514_v46, %v2128_v34 }
 0x148   : > { %v518_v48 = vpop.f32.mrb[30].mxu0  ;;  %v517_v52 = vadd.f32 %v516_v47, %v2131_v36 }
 0x149   : > { %v519_v50 = vadd.f32 %v518_v48, %v2128_v34  ;;  %v520_v51 = vpop.f32.mrb[31].mxu0  ;;  %v1904_v34 = vld [vmem:[%s2379_s5 + $0x40] sm:$0xff]  }
 0x14a   : > { %v521_v53 = vadd.f32 %v520_v51, %v2131_v36  ;;  %v1905_v36 = vld [vmem:[%s2379_s5] sm:$0xff]   ;;  %1758 = vmatprep.subr.bf16.mxu1 %v1904_v34  ;;  %1694 = vmatprep.subr.bf16.mxu0 %v1904_v34 }
 0x14b   : > { %v537_v54 = vpack.c.bf16 %v519_v50, %v515_v49  ;;  %1766 = vmatpush3.bf16.msra.mxu1 %v1905_v36 }
 0x14c   : > { %v538_v55 = vpack.c.bf16 %v521_v53, %v517_v52  ;;  %1759 = vmatprep.subr.bf16.mxu1 %v1906_v60 }
 0x14e   : > { %844 = vmatprep.mubr.bf16.mxu1 %v538_v55 }
 0x14f   : > { %845 = vmatmul.mubr.bf16.gmra.mrb[28].mxu1 %v537_v54 }
 0x150   : > { %1767 = vmatpush3.bf16.msra.mxu1 %v1907_v61 }
 0x151   : > { %1760 = vmatprep.subr.bf16.mxu1 %v1908_v62 }
 0x154   : > { %1768 = vmatpush3.bf16.msra.mxu1 %v1909_v63 }
 0x155   : > { %1761 = vmatprep.subr.bf16.mxu1 %v1910_v1 }
 0x158   : > { %1769 = vmatpush3.bf16.msra.mxu1 %v2189_v2 }
 0x159   : > { %1762 = vmatprep.subr.bf16.mxu1 %v2194_v3 }
 0x15c   : > { %1770 = vmatpush3.bf16.msra.mxu1 %v2201_v4 }
 0x15d   : > { %1763 = vmatprep.subr.bf16.mxu1 %v2206_v5 }
 0x1ea   : > { %v776_v8 = vpop.f32.mrb[0].mxu1 }
 0x1eb   : > { %v777_v9 = vadd.f32 %v776_v8, %v2214_v6  ;;  %v778_v10 = vpop.f32.mrb[1].mxu1 }
 0x1ec   : > { %v779_v11 = vadd.f32 %v778_v10, %v2217_v7  ;;  %v780_v12 = vpop.f32.mrb[2].mxu1 }
 0x1ed   : > { %v781_v13 = vadd.f32 %v780_v12, %v2214_v6  ;;  %v782_v14 = vpop.f32.mrb[3].mxu1  ;;  %v855_v16 = vmax.f32 %v777_v9, 0.0 }
 0x1ee   : > { %v783_v15 = vadd.f32 %v782_v14, %v2217_v7  ;;  %v856_v18 = vmax.f32 %v779_v11, 0.0 }
 0x1ef   : > { %v857_v17 = vmax.f32 %v781_v13, 0.0 }
 0x1f0   : > { %v858_v19 = vmax.f32 %v783_v15, 0.0 }
 0x1f1   : > { %v887_v20 = vpack.c.bf16 %v857_v17, %v855_v16 }
 0x1f2   : > { %v888_v21 = vpack.c.bf16 %v858_v19, %v856_v18  ;;  %v786_v22 = vpop.f32.mrb[4].mxu1 }
 0x1f3   : > { %v787_v23 = vadd.f32 %v786_v22, %v2214_v6  ;;  %v788_v24 = vpop.f32.mrb[5].mxu1 }
 0x1f4   : > { %v789_v25 = vadd.f32 %v788_v24, %v2217_v7  ;;  %v790_v26 = vpop.f32.mrb[6].mxu1  ;;  %1139 = vmatprep.mubr.bf16.mxu0 %v888_v21 }
 0x1f5   : > { %v791_v27 = vadd.f32 %v790_v26, %v2214_v6  ;;  %v792_v28 = vpop.f32.mrb[7].mxu1  ;;  %1140 = vmatmul.mubr.bf16.vlgmr.msra.gmra.mrb[32].mxu0 %v887_v20  ;;  %v859_v30 = vmax.f32 %v787_v23, 0.0 }
 0x1f6   : > { %v793_v29 = vadd.f32 %v792_v28, %v2217_v7  ;;  %1695 = vmatpush3.bf16.msra.mxu0 %v1905_v36  ;;  %v860_v35 = vmax.f32 %v789_v25, 0.0 }
 0x1f7   : > { %v861_v32 = vmax.f32 %v791_v27, 0.0  ;;  %1696 = vmatprep.subr.bf16.mxu0 %v1906_v60 }
 0x1f8   : > { %v862_v37 = vmax.f32 %v793_v29, 0.0 }
 0x1f9   : > { %v889_v38 = vpack.c.bf16 %v861_v32, %v859_v30 }
 0x1fa   : > { %v890_v39 = vpack.c.bf16 %v862_v37, %v860_v35  ;;  %v796_v40 = vpop.f32.mrb[8].mxu1  ;;  %1697 = vmatpush3.bf16.msra.mxu0 %v1907_v61 }
 0x1fb   : > { %v797_v41 = vadd.f32 %v796_v40, %v2214_v6  ;;  %v798_v42 = vpop.f32.mrb[9].mxu1  ;;  %1698 = vmatprep.subr.bf16.mxu0 %v1908_v62 }
 0x1fc   : > { %v799_v43 = vadd.f32 %v798_v42, %v2217_v7  ;;  %v800_v44 = vpop.f32.mrb[10].mxu1  ;;  %1149 = vmatprep.mubr.bf16.mxu0 %v890_v39 }
 0x1fd   : > { %v801_v45 = vadd.f32 %v800_v44, %v2214_v6  ;;  %v802_v46 = vpop.f32.mrb[11].mxu1  ;;  %1150 = vmatmul.mubr.bf16.gmra.mrb[36].mxu0 %v889_v38  ;;  %v863_v48 = vmax.f32 %v797_v41, 0.0 }
 0x1fe   : > { %v803_v47 = vadd.f32 %v802_v46, %v2217_v7  ;;  %1699 = vmatpush3.bf16.msra.mxu0 %v1909_v63  ;;  %v864_v50 = vmax.f32 %v799_v43, 0.0 }
 0x1ff   : > { %v865_v49 = vmax.f32 %v801_v45, 0.0  ;;  %1700 = vmatprep.subr.bf16.mxu0 %v1910_v1 }
 0x200   : > { %v866_v51 = vmax.f32 %v803_v47, 0.0 }
 0x201   : > { %v891_v52 = vpack.c.bf16 %v865_v49, %v863_v48 }
 0x202   : > { %v892_v53 = vpack.c.bf16 %v866_v51, %v864_v50  ;;  %v806_v54 = vpop.f32.mrb[12].mxu1  ;;  %1701 = vmatpush3.bf16.msra.mxu0 %v2189_v2 }
 0x203   : > { %v807_v55 = vadd.f32 %v806_v54, %v2214_v6  ;;  %v808_v56 = vpop.f32.mrb[13].mxu1  ;;  %1702 = vmatprep.subr.bf16.mxu0 %v2194_v3 }
 0x204   : > { %v809_v57 = vadd.f32 %v808_v56, %v2217_v7  ;;  %v810_v58 = vpop.f32.mrb[14].mxu1  ;;  %1159 = vmatprep.mubr.bf16.mxu0 %v892_v53 }
 0x205   : > { %v811_v59 = vadd.f32 %v810_v58, %v2214_v6  ;;  %v812_v34 = vpop.f32.mrb[15].mxu1  ;;  %1160 = vmatmul.mubr.bf16.gmra.mrb[40].mxu0 %v891_v52  ;;  %v867_v60 = vmax.f32 %v807_v55, 0.0 }
 0x206   : > { %v813_v36 = vadd.f32 %v812_v34, %v2217_v7  ;;  %1703 = vmatpush3.bf16.msra.mxu0 %v2201_v4  ;;  %v868_v62 = vmax.f32 %v809_v57, 0.0 }
 0x207   : > { %v869_v61 = vmax.f32 %v811_v59, 0.0  ;;  %1704 = vmatprep.subr.bf16.mxu0 %v2206_v5 }
 0x208   : > { %v870_v63 = vmax.f32 %v813_v36, 0.0 }
 0x209   : > { %v893_v1 = vpack.c.bf16 %v869_v61, %v867_v60 }
 0x20a   : > { %v894_v2 = vpack.c.bf16 %v870_v63, %v868_v62  ;;  %v816_v3 = vpop.f32.mrb[16].mxu1  ;;  %v1915_v62 = vld [vmem:[%s2379_s5 + $0x28] sm:$0xff]   ;;  %v1918_v63 = vld [vmem:[%s2379_s5 + $0x78] sm:$0xff]  }
 0x20b   : > { %v817_v0 = vadd.f32 %v816_v3, %v2214_v6  ;;  %v818_v8 = vpop.f32.mrb[17].mxu1  ;;  %1705 = vmatpush3.bf16.msra.mxu0 %v1915_v62  ;;  %1771 = vmatpush3.bf16.msra.mxu1 %v1915_v62 }
 0x20c   : > { %v819_v9 = vadd.f32 %v818_v8, %v2217_v7  ;;  %v820_v10 = vpop.f32.mrb[18].mxu1  ;;  %1169 = vmatprep.mubr.bf16.mxu0 %v894_v2  ;;  %v324_v2 = vld [vmem:[%s2378_s4 + $0x2] sm:$0x3] }
 0x20d   : > { %v821_v11 = vadd.f32 %v820_v10, %v2214_v6  ;;  %v822_v12 = vpop.f32.mrb[19].mxu1  ;;  %1170 = vmatmul.mubr.bf16.gmra.mrb[44].mxu0 %v893_v1  ;;  %v871_v13 = vmax.f32 %v817_v0, 0.0  ;;  %v1919_v1 = vld [vmem:[%s2379_s5 + $0x38] sm:$0xff]   ;;  %v2274_v3 = vrot.slane %v324_v2, %v2120_v31  ;;  %v2277_v0 = vrot.slane %v324_v2, %v2125_v33 }
 0x20e   : > { %v823_v4 = vadd.f32 %v822_v12, %v2217_v7  ;;  %v872_v14 = vmax.f32 %v819_v9, 0.0 }
 0x20f   : > { %v873_v5 = vmax.f32 %v821_v11, 0.0 }
 0x210   : > { %v874_v15 = vmax.f32 %v823_v4, 0.0 }
 0x211   : > { %v895_v16 = vpack.c.bf16 %v873_v5, %v871_v13 }
 0x212   : > { %v896_v17 = vpack.c.bf16 %v874_v15, %v872_v14  ;;  %v826_v18 = vpop.f32.mrb[20].mxu1 }
 0x213   : > { %v827_v19 = vadd.f32 %v826_v18, %v2214_v6  ;;  %v828_v20 = vpop.f32.mrb[21].mxu1 }
 0x214   : > { %v829_v21 = vadd.f32 %v828_v20, %v2217_v7  ;;  %v830_v22 = vpop.f32.mrb[22].mxu1  ;;  %1179 = vmatprep.mubr.bf16.mxu0 %v896_v17 }
 0x215   : > { %v831_v23 = vadd.f32 %v830_v22, %v2214_v6  ;;  %v832_v24 = vpop.f32.mrb[23].mxu1  ;;  %1180 = vmatmul.mubr.bf16.gmra.mrb[48].mxu0 %v895_v16  ;;  %v875_v26 = vmax.f32 %v827_v19, 0.0 }
 0x216   : > { %v833_v25 = vadd.f32 %v832_v24, %v2217_v7  ;;  %v876_v28 = vmax.f32 %v829_v21, 0.0 }
 0x217   : > { %v877_v27 = vmax.f32 %v831_v23, 0.0 }
 0x218   : > { %v878_v29 = vmax.f32 %v833_v25, 0.0 }
 0x219   : > { %v897_v30 = vpack.c.bf16 %v877_v27, %v875_v26 }
 0x21a   : > { %v898_v32 = vpack.c.bf16 %v878_v29, %v876_v28  ;;  %v836_v35 = vpop.f32.mrb[24].mxu1 }
 0x21b   : > { %v837_v37 = vadd.f32 %v836_v35, %v2214_v6  ;;  %v838_v38 = vpop.f32.mrb[25].mxu1 }
 0x21c   : > { %v839_v39 = vadd.f32 %v838_v38, %v2217_v7  ;;  %v840_v40 = vpop.f32.mrb[26].mxu1  ;;  %1189 = vmatprep.mubr.bf16.mxu0 %v898_v32 }
 0x21d   : > { %v841_v41 = vadd.f32 %v840_v40, %v2214_v6  ;;  %v842_v42 = vpop.f32.mrb[27].mxu1  ;;  %1190 = vmatmul.mubr.bf16.gmra.mrb[52].mxu0 %v897_v30  ;;  %v879_v44 = vmax.f32 %v837_v37, 0.0 }
 0x21e   : > { %v843_v43 = vadd.f32 %v842_v42, %v2217_v7  ;;  %v880_v46 = vmax.f32 %v839_v39, 0.0 }
 0x21f   : > { %v881_v45 = vmax.f32 %v841_v41, 0.0 }
 0x220   : > { %v882_v47 = vmax.f32 %v843_v43, 0.0 }
 0x221   : > { %v899_v48 = vpack.c.bf16 %v881_v45, %v879_v44 }
 0x222   : > { %v900_v49 = vpack.c.bf16 %v882_v47, %v880_v46  ;;  %v846_v50 = vpop.f32.mrb[28].mxu1 }
 0x223   : > { %v847_v51 = vadd.f32 %v846_v50, %v2214_v6  ;;  %v848_v52 = vpop.f32.mrb[29].mxu1 }
 0x224   : > { %v849_v53 = vadd.f32 %v848_v52, %v2217_v7  ;;  %v850_v54 = vpop.f32.mrb[30].mxu1  ;;  %1199 = vmatprep.mubr.bf16.mxu0 %v900_v49 }
 0x225   : > { %v851_v55 = vadd.f32 %v850_v54, %v2214_v6  ;;  %v852_v56 = vpop.f32.mrb[31].mxu1  ;;  %1200 = vmatmul.mubr.bf16.gmra.mrb[56].mxu0 %v899_v48  ;;  %v883_v58 = vmax.f32 %v847_v51, 0.0  ;;  %v1916_v6 = vld [vmem:[%s2379_s5 + $0x70] sm:$0xff]  }
 0x226   : > { %v853_v57 = vadd.f32 %v852_v56, %v2217_v7  ;;  %v884_v34 = vmax.f32 %v849_v53, 0.0  ;;  %v1917_v7 = vld [vmem:[%s2379_s5 + $0x30] sm:$0xff]   ;;  %1706 = vmatprep.subr.bf16.mxu0 %v1916_v6  ;;  %1764 = vmatprep.subr.bf16.mxu1 %v1916_v6 }
 0x227   : > { %v885_v59 = vmax.f32 %v851_v55, 0.0  ;;  %1707 = vmatpush3.bf16.msra.mxu0 %v1917_v7  ;;  %1772 = vmatpush3.bf16.msra.mxu1 %v1917_v7 }
 0x228   : > { %v886_v36 = vmax.f32 %v853_v57, 0.0  ;;  %1708 = vmatprep.subr.bf16.mxu0 %v1918_v63  ;;  %1765 = vmatprep.subr.bf16.mxu1 %v1918_v63 }
 0x229   : > { %v901_v60 = vpack.c.bf16 %v885_v59, %v883_v58 }
 0x22a   : > { %v902_v61 = vpack.c.bf16 %v886_v36, %v884_v34 }
 0x22b   : > { %1709 = vmatpush3.bf16.msra.mxu0 %v1919_v1  ;;  %1773 = vmatpush3.bf16.msra.mxu1 %v1919_v1 }
 0x22c   : > { %1209 = vmatprep.mubr.bf16.mxu0 %v902_v61 }
 0x22d   : > { %1210 = vmatmul.mubr.bf16.gmra.mrb[60].mxu0 %v901_v60 }
 0x2c8   : > { %v1141_v8 = vpop.f32.mrb[32].mxu0 }
 0x2c9   : > { %v1142_v9 = vadd.f32 %v1141_v8, %v2274_v3  ;;  %v1143_v10 = vpop.f32.mrb[33].mxu0 }
 0x2ca   : > { %v1144_v11 = vadd.f32 %v1143_v10, %v2277_v0  ;;  %v1145_v12 = vpop.f32.mrb[34].mxu0 }
 0x2cb   : > { %v1146_v4 = vadd.f32 %v1145_v12, %v2274_v3  ;;  %v1147_v13 = vpop.f32.mrb[35].mxu0  ;;  %v1220_v14 = vmax.f32 %v1142_v9, 0.0 }
 0x2cc   : > { %v1148_v5 = vadd.f32 %v1147_v13, %v2277_v0  ;;  %v1221_v16 = vmax.f32 %v1144_v11, 0.0 }
 0x2cd   : > { %v1222_v15 = vmax.f32 %v1146_v4, 0.0 }
 0x2ce   : > { %v1223_v31 = vmax.f32 %v1148_v5, 0.0 }
 0x2cf   : > { %v1252_v17 = vpack.c.bf16 %v1222_v15, %v1220_v14 }
 0x2d0   : > { %v1253_v18 = vpack.c.bf16 %v1223_v31, %v1221_v16  ;;  %v1151_v33 = vpop.f32.mrb[36].mxu0 }
 0x2d1   : > { %v1152_v19 = vadd.f32 %v1151_v33, %v2274_v3  ;;  %v1153_v20 = vpop.f32.mrb[37].mxu0 }
 0x2d2   : > { %v1154_v21 = vadd.f32 %v1153_v20, %v2277_v0  ;;  %v1155_v22 = vpop.f32.mrb[38].mxu0  ;;  %1434 = vmatprep.mubr.bf16.mxu0 %v1253_v18 }
 0x2d3   : > { %v1156_v23 = vadd.f32 %v1155_v22, %v2274_v3  ;;  %v1157_v24 = vpop.f32.mrb[39].mxu0  ;;  %1435 = vmatmul.mubr.bf16.vlgmr.msra.gmra.mrb[64].mxu0 %v1252_v17  ;;  %v1224_v26 = vmax.f32 %v1152_v19, 0.0 }
 0x2d4   : > { %v1158_v25 = vadd.f32 %v1157_v24, %v2277_v0  ;;  %v1225_v28 = vmax.f32 %v1154_v21, 0.0 }
 0x2d5   : > { %v1226_v27 = vmax.f32 %v1156_v23, 0.0 }
 0x2d6   : > { %v1227_v29 = vmax.f32 %v1158_v25, 0.0 }
 0x2d7   : > { %v1254_v30 = vpack.c.bf16 %v1226_v27, %v1224_v26 }
 0x2d8   : > { %v1255_v32 = vpack.c.bf16 %v1227_v29, %v1225_v28  ;;  %v1161_v35 = vpop.f32.mrb[40].mxu0 }
 0x2d9   : > { %v1162_v37 = vadd.f32 %v1161_v35, %v2274_v3  ;;  %v1163_v38 = vpop.f32.mrb[41].mxu0 }
 0x2da   : > { %v1164_v39 = vadd.f32 %v1163_v38, %v2277_v0  ;;  %v1165_v40 = vpop.f32.mrb[42].mxu0  ;;  %1442 = vmatprep.mubr.bf16.mxu0 %v1255_v32 }
 0x2db   : > { %v1166_v41 = vadd.f32 %v1165_v40, %v2274_v3  ;;  %v1167_v42 = vpop.f32.mrb[43].mxu0  ;;  %1443 = vmatmul.mubr.bf16.gmra.mrb[68].mxu0 %v1254_v30  ;;  %v1228_v44 = vmax.f32 %v1162_v37, 0.0 }
 0x2dc   : > { %v1168_v43 = vadd.f32 %v1167_v42, %v2277_v0  ;;  %v1229_v46 = vmax.f32 %v1164_v39, 0.0 }
 0x2dd   : > { %v1230_v45 = vmax.f32 %v1166_v41, 0.0 }
 0x2de   : > { %v1231_v47 = vmax.f32 %v1168_v43, 0.0 }
 0x2df   : > { %v1256_v48 = vpack.c.bf16 %v1230_v45, %v1228_v44 }
 0x2e0   : > { %v1257_v49 = vpack.c.bf16 %v1231_v47, %v1229_v46  ;;  %v1171_v50 = vpop.f32.mrb[44].mxu0 }
 0x2e1   : > { %v1172_v51 = vadd.f32 %v1171_v50, %v2274_v3  ;;  %v1173_v52 = vpop.f32.mrb[45].mxu0 }
 0x2e2   : > { %v1174_v53 = vadd.f32 %v1173_v52, %v2277_v0  ;;  %v1175_v54 = vpop.f32.mrb[46].mxu0  ;;  %1450 = vmatprep.mubr.bf16.mxu0 %v1257_v49 }
 0x2e3   : > { %v1176_v55 = vadd.f32 %v1175_v54, %v2274_v3  ;;  %v1177_v56 = vpop.f32.mrb[47].mxu0  ;;  %1451 = vmatmul.mubr.bf16.gmra.mrb[72].mxu0 %v1256_v48  ;;  %v1232_v58 = vmax.f32 %v1172_v51, 0.0 }
 0x2e4   : > { %v1178_v57 = vadd.f32 %v1177_v56, %v2277_v0  ;;  %v1233_v34 = vmax.f32 %v1174_v53, 0.0 }
 0x2e5   : > { %v1234_v59 = vmax.f32 %v1176_v55, 0.0 }
 0x2e6   : > { %v1235_v36 = vmax.f32 %v1178_v57, 0.0 }
 0x2e7   : > { %v1258_v60 = vpack.c.bf16 %v1234_v59, %v1232_v58  ;;  %v2314_v59 = vld [vmem:[%s2380_s6] ss:$0 sm:$0xff] }
 0x2e8   : > { %v1259_v61 = vpack.c.bf16 %v1235_v36, %v1233_v34  ;;  %v1181_v62 = vpop.f32.mrb[48].mxu0 }
 0x2e9   : > { %v1182_v6 = vadd.f32 %v1181_v62, %v2274_v3  ;;  %v1183_v7 = vpop.f32.mrb[49].mxu0 }
 0x2ea   : > { %v1184_v63 = vadd.f32 %v1183_v7, %v2277_v0  ;;  %v1185_v1 = vpop.f32.mrb[50].mxu0  ;;  %1458 = vmatprep.mubr.bf16.mxu1 %v1259_v61 }
 0x2eb   : > { %v1186_v2 = vadd.f32 %v1185_v1, %v2274_v3  ;;  %v1187_v8 = vpop.f32.mrb[51].mxu0  ;;  %1459 = vmatmul.mubr.bf16.vlgmr.msra.gmra.mrb[32].mxu1 %v1258_v60  ;;  %v1236_v10 = vmax.f32 %v1182_v6, 0.0 }
 0x2ec   : > { %v1188_v9 = vadd.f32 %v1187_v8, %v2277_v0  ;;  %v1237_v12 = vmax.f32 %v1184_v63, 0.0 }
 0x2ed   : > { %v1238_v11 = vmax.f32 %v1186_v2, 0.0 }
 0x2ee   : > { %v1239_v4 = vmax.f32 %v1188_v9, 0.0 }
 0x2ef   : > { %v1260_v13 = vpack.c.bf16 %v1238_v11, %v1236_v10 }
 0x2f0   : > { %v1261_v5 = vpack.c.bf16 %v1239_v4, %v1237_v12  ;;  %v1191_v14 = vpop.f32.mrb[52].mxu0 }
 0x2f1   : > { %v1192_v15 = vadd.f32 %v1191_v14, %v2274_v3  ;;  %v1193_v16 = vpop.f32.mrb[53].mxu0 }
 0x2f2   : > { %v1194_v31 = vadd.f32 %v1193_v16, %v2277_v0  ;;  %v1195_v17 = vpop.f32.mrb[54].mxu0  ;;  %1466 = vmatprep.mubr.bf16.mxu1 %v1261_v5 }
 0x2f3   : > { %v1196_v18 = vadd.f32 %v1195_v17, %v2274_v3  ;;  %v1197_v33 = vpop.f32.mrb[55].mxu0  ;;  %1467 = vmatmul.mubr.bf16.gmra.mrb[36].mxu1 %v1260_v13  ;;  %v1240_v20 = vmax.f32 %v1192_v15, 0.0 }
 0x2f4   : > { %v1198_v19 = vadd.f32 %v1197_v33, %v2277_v0  ;;  %v1241_v22 = vmax.f32 %v1194_v31, 0.0 }
 0x2f5   : > { %v1242_v21 = vmax.f32 %v1196_v18, 0.0 }
 0x2f6   : > { %v1243_v23 = vmax.f32 %v1198_v19, 0.0 }
 0x2f7   : > { %v1262_v24 = vpack.c.bf16 %v1242_v21, %v1240_v20 }
 0x2f8   : > { %v1263_v25 = vpack.c.bf16 %v1243_v23, %v1241_v22  ;;  %v1201_v26 = vpop.f32.mrb[56].mxu0 }
 0x2f9   : > { %v1202_v27 = vadd.f32 %v1201_v26, %v2274_v3  ;;  %v1203_v28 = vpop.f32.mrb[57].mxu0 }
 0x2fa   : > { %v1204_v29 = vadd.f32 %v1203_v28, %v2277_v0  ;;  %v1205_v30 = vpop.f32.mrb[58].mxu0  ;;  %1474 = vmatprep.mubr.bf16.mxu1 %v1263_v25 }
 0x2fb   : > { %v1206_v32 = vadd.f32 %v1205_v30, %v2274_v3  ;;  %v1207_v35 = vpop.f32.mrb[59].mxu0  ;;  %1475 = vmatmul.mubr.bf16.gmra.mrb[40].mxu1 %v1262_v24  ;;  %v1244_v38 = vmax.f32 %v1202_v27, 0.0 }
 0x2fc   : > { %v1208_v37 = vadd.f32 %v1207_v35, %v2277_v0  ;;  %v1245_v40 = vmax.f32 %v1204_v29, 0.0 }
 0x2fd   : > { %v1246_v39 = vmax.f32 %v1206_v32, 0.0 }
 0x2fe   : > { %v1247_v41 = vmax.f32 %v1208_v37, 0.0 }
 0x2ff   : > { %v1264_v42 = vpack.c.bf16 %v1246_v39, %v1244_v38 }
 0x300   : > { %v1265_v43 = vpack.c.bf16 %v1247_v41, %v1245_v40  ;;  %v1211_v44 = vpop.f32.mrb[60].mxu0 }
 0x301   : > { %v1212_v45 = vadd.f32 %v1211_v44, %v2274_v3  ;;  %v1213_v46 = vpop.f32.mrb[61].mxu0 }
 0x302   : > { %v1214_v47 = vadd.f32 %v1213_v46, %v2277_v0  ;;  %v1215_v48 = vpop.f32.mrb[62].mxu0  ;;  %1482 = vmatprep.mubr.bf16.mxu1 %v1265_v43 }
 0x303   : > { %v1216_v49 = vadd.f32 %v1215_v48, %v2274_v3  ;;  %v1217_v50 = vpop.f32.mrb[63].mxu0  ;;  %1483 = vmatmul.mubr.bf16.gmra.mrb[44].mxu1 %v1264_v42  ;;  %v1248_v52 = vmax.f32 %v1212_v45, 0.0 }
 0x304   : > { %v1218_v51 = vadd.f32 %v1217_v50, %v2277_v0  ;;  %v1249_v54 = vmax.f32 %v1214_v47, 0.0 }
 0x305   : > { %v1250_v53 = vmax.f32 %v1216_v49, 0.0 }
 0x306   : > { %v1251_v55 = vmax.f32 %v1218_v51, 0.0 }
 0x307   : > { %v1266_v56 = vpack.c.bf16 %v1250_v53, %v1248_v52 }
 0x308   : > { %v1267_v57 = vpack.c.bf16 %v1251_v55, %v1249_v54 }
 0x30a   : > { %1490 = vmatprep.mubr.bf16.mxu1 %v1267_v57 }
 0x30b   : > { %1491 = vmatmul.mubr.bf16.gmra.mrb[48].mxu1 %v1266_v56 }
 0x3a6   : > { %v1710_v58 = vpop.f32.mrb[64].mxu0 }
 0x3a7   : > { %v1711_v3 = vpop.f32.mrb[65].mxu0 }
 0x3a8   : > { %v1712_v34 = vadd.f32 %v1711_v3, %v1710_v58  ;;  %v1713_v36 = vpop.f32.mrb[66].mxu0 }
 0x3a9   : > { %v1714_v0 = vpop.f32.mrb[67].mxu0 }
 0x3aa   : > { %v1437_v60 = vadd.f32 %v1712_v34, %v2314_v59  ;;  %v1715_v61 = vadd.f32 %v1714_v0, %v1713_v36 }
 0x3ac   : > { %1500 = vst.msk [vmem:[%s2321_s22] sm:$0xff] %vm1499_vm1, %v1437_v60  ;;  %v1440_v62 = vadd.f32 %v1715_v61, %v2314_v59 }
 0x3ae   : > { %1501 = vst.msk [vmem:[%s2321_s22 + $0x8] sm:$0xff] %vm1499_vm1, %v1440_v62  ;;  %v1716_v6 = vpop.f32.mrb[68].mxu0 }
 0x3af   : > { %v1717_v7 = vpop.f32.mrb[69].mxu0 }
 0x3b0   : > { %v1718_v63 = vadd.f32 %v1717_v7, %v1716_v6  ;;  %v1719_v1 = vpop.f32.mrb[70].mxu0 }
 0x3b1   : > { %v1720_v2 = vpop.f32.mrb[71].mxu0 }
 0x3b2   : > { %v1445_v8 = vadd.f32 %v1718_v63, %v2314_v59  ;;  %v1721_v9 = vadd.f32 %v1720_v2, %v1719_v1 }
 0x3b4   : > { %1502 = vst.msk [vmem:[%s2321_s22 + $0x10] sm:$0xff] %vm1499_vm1, %v1445_v8  ;;  %v1448_v10 = vadd.f32 %v1721_v9, %v2314_v59 }
 0x3b6   : > { %1503 = vst.msk [vmem:[%s2321_s22 + $0x18] sm:$0xff] %vm1499_vm1, %v1448_v10  ;;  %v1722_v11 = vpop.f32.mrb[72].mxu0 }
 0x3b7   : > { %v1723_v12 = vpop.f32.mrb[73].mxu0 }
 0x3b8   : > { %v1724_v4 = vadd.f32 %v1723_v12, %v1722_v11  ;;  %v1725_v13 = vpop.f32.mrb[74].mxu0 }
 0x3b9   : > { %v1726_v5 = vpop.f32.mrb[75].mxu0 }
 0x3ba   : > { %v1453_v14 = vadd.f32 %v1724_v4, %v2314_v59  ;;  %v1727_v15 = vadd.f32 %v1726_v5, %v1725_v13 }
 0x3bc   : > { %1504 = vst.msk [vmem:[%s2321_s22 + $0x20] sm:$0xff] %vm1499_vm1, %v1453_v14  ;;  %v1456_v16 = vadd.f32 %v1727_v15, %v2314_v59 }
 0x3be   : > { %1505 = vst.msk [vmem:[%s2321_s22 + $0x28] sm:$0xff] %vm1499_vm1, %v1456_v16  ;;  %v1728_v31 = vpop.f32.mrb[32].mxu1 }
 0x3bf   : > { %v1729_v17 = vpop.f32.mrb[33].mxu1 }
 0x3c0   : > { %v1730_v18 = vadd.f32 %v1729_v17, %v1728_v31  ;;  %v1731_v33 = vpop.f32.mrb[34].mxu1 }
 0x3c1   : > { %v1732_v19 = vpop.f32.mrb[35].mxu1 }
 0x3c2   : > { %v1461_v20 = vadd.f32 %v1730_v18, %v2314_v59  ;;  %v1733_v21 = vadd.f32 %v1732_v19, %v1731_v33 }
 0x3c4   : > { %1506 = vst.msk [vmem:[%s2321_s22 + $0x30] sm:$0xff] %vm1499_vm1, %v1461_v20  ;;  %v1464_v22 = vadd.f32 %v1733_v21, %v2314_v59 }
 0x3c6   : > { %1507 = vst.msk [vmem:[%s2321_s22 + $0x38] sm:$0xff] %vm1499_vm1, %v1464_v22  ;;  %v1734_v23 = vpop.f32.mrb[36].mxu1 }
 0x3c7   : > { %v1735_v24 = vpop.f32.mrb[37].mxu1 }
 0x3c8   : > { %v1736_v25 = vadd.f32 %v1735_v24, %v1734_v23  ;;  %v1737_v26 = vpop.f32.mrb[38].mxu1 }
 0x3c9   : > { %v1738_v27 = vpop.f32.mrb[39].mxu1 }
 0x3ca   : > { %v1469_v28 = vadd.f32 %v1736_v25, %v2314_v59  ;;  %v1739_v29 = vadd.f32 %v1738_v27, %v1737_v26 }
 0x3cc   : > { %1508 = vst.msk [vmem:[%s2321_s22 + $0x40] sm:$0xff] %vm1499_vm1, %v1469_v28  ;;  %v1472_v30 = vadd.f32 %v1739_v29, %v2314_v59 }
 0x3ce   : > { %1509 = vst.msk [vmem:[%s2321_s22 + $0x48] sm:$0xff] %vm1499_vm1, %v1472_v30  ;;  %v1740_v32 = vpop.f32.mrb[40].mxu1 }
 0x3cf   : > { %v1741_v35 = vpop.f32.mrb[41].mxu1 }
 0x3d0   : > { %v1742_v37 = vadd.f32 %v1741_v35, %v1740_v32  ;;  %v1743_v38 = vpop.f32.mrb[42].mxu1 }
 0x3d1   : > { %v1744_v39 = vpop.f32.mrb[43].mxu1 }
 0x3d2   : > { %v1477_v40 = vadd.f32 %v1742_v37, %v2314_v59  ;;  %v1745_v41 = vadd.f32 %v1744_v39, %v1743_v38 }
 0x3d4   : > { %1510 = vst.msk [vmem:[%s2321_s22 + $0x50] sm:$0xff] %vm1499_vm1, %v1477_v40  ;;  %v1480_v42 = vadd.f32 %v1745_v41, %v2314_v59 }
 0x3d6   : > { %1511 = vst.msk [vmem:[%s2321_s22 + $0x58] sm:$0xff] %vm1499_vm1, %v1480_v42  ;;  %v1746_v43 = vpop.f32.mrb[44].mxu1 }
 0x3d7   : > { %v1747_v44 = vpop.f32.mrb[45].mxu1 }
 0x3d8   : > { %v1748_v45 = vadd.f32 %v1747_v44, %v1746_v43  ;;  %v1749_v46 = vpop.f32.mrb[46].mxu1 }
 0x3d9   : > { %v1750_v47 = vpop.f32.mrb[47].mxu1 }
 0x3da   : > { %v1485_v48 = vadd.f32 %v1748_v45, %v2314_v59  ;;  %v1751_v49 = vadd.f32 %v1750_v47, %v1749_v46 }
 0x3dc   : > { %1512 = vst.msk [vmem:[%s2321_s22 + $0x60] sm:$0xff] %vm1499_vm1, %v1485_v48  ;;  %v1488_v50 = vadd.f32 %v1751_v49, %v2314_v59 }
 0x3de   : > { %1513 = vst.msk [vmem:[%s2321_s22 + $0x68] sm:$0xff] %vm1499_vm1, %v1488_v50  ;;  %v1752_v51 = vpop.f32.mrb[48].mxu1 }
 0x3df   : > { %v1753_v52 = vpop.f32.mrb[49].mxu1 }
 0x3e0   : > { %v1754_v53 = vadd.f32 %v1753_v52, %v1752_v51  ;;  %v1755_v54 = vpop.f32.mrb[50].mxu1 }
 0x3e1   : > { %v1756_v55 = vpop.f32.mrb[51].mxu1 }
 0x3e2   : > { %v1493_v56 = vadd.f32 %v1754_v53, %v2314_v59  ;;  %v1757_v57 = vadd.f32 %v1756_v55, %v1755_v54 }
 0x3e4   : > { %1514 = vst.msk [vmem:[%s2321_s22 + $0x70] sm:$0xff] %vm1499_vm1, %v1493_v56  ;;  %v1496_v58 = vadd.f32 %v1757_v57, %v2314_v59 }
 0x3e6   : > { %1515 = vst.msk [vmem:[%s2321_s22 + $0x78] sm:$0xff] %vm1499_vm1, %v1496_v58 }
 0x3e7 PF: > { %s18_s24 = sadd.s32 1, %s1958_s24  }
 0x3e8   : > { %p15_p3 = scmp.ge.s32.totalorder %s18_s24, 4  }
 0x3ea   :  { %17 = sbr.rel (!%p15_p3) target bundleno = 1 (0x1), region = 84 }
 0x3f1   :  { %1538 = vsyncpa [#allocation3], 1 }
 0x3f2   :  { %1540 = vsyncpa [#allocation3 + $0x1], 1 }

</bundles_post_ra>
